<compile_context>
chip_gen: v6e
topology: v6e:2x2x1
jax: 0.10.0
libtpu: 0.0.40
codegen_flags: <defaults>
</compile_context>

<pallas_src>
import functools

import jax
import jax.numpy as jnp
from jax.experimental import pallas as pl
from jax.experimental.pallas import tpu as pltpu

ACTION_OUTPUT_DIM = 4
HIDDEN_LAYERS = (64, 128)
INPUT_DIM = 32


def _qlearner_kernel(x_ref, w1_ref, b1_ref, w2_ref, b2_ref, w3_ref, b3_ref, o_ref):
    # Layer 1: Linear(32 -> 64) + ReLU. bf16 operands feed the MXU; accumulate in f32.
    h1 = jnp.dot(x_ref[...], w1_ref[...], preferred_element_type=jnp.float32)
    h1 = jnp.maximum(h1 + b1_ref[...], 0.0)  # f32 VPU math (v5e has no bf16 VPU)
    # Layer 2: Linear(64 -> 128) + ReLU.
    h2 = jnp.dot(h1.astype(jnp.bfloat16), w2_ref[...], preferred_element_type=jnp.float32)
    h2 = jnp.maximum(h2 + b2_ref[...], 0.0)
    # Layer 3: Linear(128 -> 4), no activation.
    o = jnp.dot(h2.astype(jnp.bfloat16), w3_ref[...], preferred_element_type=jnp.float32)
    o_ref[...] = (o + b3_ref[...]).astype(o_ref.dtype)
    # TODO(synk): lane-dense output packing ((TB,4)->(TB//32,128)) skipped: the required
    # in-kernel reshape changes the minor dim (risky Mosaic shape_cast); output is only
    # 16 B/row so the masked stores stay hidden behind the x HBM read stream.


def _round_up(x, m):
    return (x + m - 1) // m * m


@functools.partial(jax.jit, static_argnames=("block_b",))
def q_learner_forward(x, params, *, block_b=1024):
    """x: (B, ...) flattening to (B, INPUT_DIM). Returns (B, ACTION_OUTPUT_DIM) f32."""
    B = x.shape[0]
    x2d = x.reshape(B, -1)
    assert x2d.shape[1] == INPUT_DIM, f"expected flattened dim {INPUT_DIM}, got {x2d.shape[1]}"
    w1, b1, w2, b2, w3, b3 = params

    # Batch tile: multiple of 128 satisfies (sublane, lane) tiling for any dtype and keeps
    # the MXU M dimension filled; pad the batch up to a tile multiple (pad rows sliced off).
    tb = min(block_b, _round_up(B, 128))
    Bp = _round_up(B, tb)
    if Bp != B:
        x2d = jnp.pad(x2d, ((0, Bp - B), (0, 0)))

    # bf16 matmul operands (halves x HBM traffic, full-rate MXU on v6e/v7x);
    # biases stay f32 so all elementwise work is f32 (incl. v5e).
    x_bf = x2d.astype(jnp.bfloat16)
    w1b, w2b, w3b = (w.astype(jnp.bfloat16) for w in (w1, w2, w3))
    b1f, b2f, b3f = (b.astype(jnp.float32) for b in (b1, b2, b3))

    grid = (Bp // tb,)
    resident = lambda shape: pl.BlockSpec(shape, lambda i: (0, 0))  # weights: DMA once, stay in VMEM

    flops = 2 * Bp * (INPUT_DIM * HIDDEN_LAYERS[0]
                      + HIDDEN_LAYERS[0] * HIDDEN_LAYERS[1]
                      + HIDDEN_LAYERS[1] * ACTION_OUTPUT_DIM)
    bytes_accessed = (
        Bp * INPUT_DIM * 2                      # x in bf16
        + Bp * ACTION_OUTPUT_DIM * 4            # output in f32
        + sum(int(a.size) * 2 for a in (w1b, w2b, w3b))
        + sum(int(a.size) * 4 for a in (b1f, b2f, b3f)))

    out = pl.pallas_call(
        _qlearner_kernel,
        out_shape=jax.ShapeDtypeStruct((Bp, ACTION_OUTPUT_DIM), jnp.float32),
        grid=grid,
        in_specs=[
            pl.BlockSpec((tb, INPUT_DIM), lambda i: (i, 0)),  # x: batch-tiled, pipelined
            resident(w1b.shape), resident(b1f.shape),
            resident(w2b.shape), resident(b2f.shape),
            resident(w3b.shape), resident(b3f.shape),
        ],
        out_specs=pl.BlockSpec((tb, ACTION_OUTPUT_DIM), lambda i: (i, 0)),
        compiler_params=pltpu.CompilerParams(
            dimension_semantics=("parallel",),  # v7x megacore sharding; no-op on v5e/v6e
        ),
        cost_estimate=pl.CostEstimate(
            flops=flops, transcendentals=0, bytes_accessed=bytes_accessed),
    )(x_bf, w1b, b1f, w2b, b2f, w3b, b3f)

    return out[:B]


def init_params(key):
    """Deterministic init mimicking nn.Linear default (uniform +/- 1/sqrt(fan_in))."""
    dims = (INPUT_DIM,) + tuple(HIDDEN_LAYERS) + (ACTION_OUTPUT_DIM,)
    params = []
    for i in range(len(dims) - 1):
        fan_in, fan_out = dims[i], dims[i + 1]
        key, kw, kb = jax.random.split(key, 3)
        bound = 1.0 / jnp.sqrt(float(fan_in))
        w = jax.random.uniform(kw, (fan_in, fan_out), jnp.float32, -bound, bound)  # (in, out)
        b = jax.random.uniform(kb, (1, fan_out), jnp.float32, -bound, bound)
        params.extend([w, b])
    return tuple(params)


def _reference_forward(x, params, *, use_bf16=True):
    w1, b1, w2, b2, w3, b3 = params
    cast = (lambda a: a.astype(jnp.bfloat16)) if use_bf16 else (lambda a: a)
    h = x.reshape(x.shape[0], -1)
    h = jnp.maximum(jnp.dot(cast(h), cast(w1), preferred_element_type=jnp.float32) + b1, 0.0)
    h = jnp.maximum(jnp.dot(cast(h), cast(w2), preferred_element_type=jnp.float32) + b2, 0.0)
    return jnp.dot(cast(h), cast(w3), preferred_element_type=jnp.float32) + b3


if __name__ == "__main__":
    key = jax.random.PRNGKey(0)
    key, kx = jax.random.split(key)
    params = init_params(key)

    # Batch of 2, input shaped (2, 4, 8) -> torch.flatten(X, 1) -> (2, 32)
    x = jax.random.normal(kx, (2, 4, 8), jnp.float32)

    out = jax.block_until_ready(q_learner_forward(x, params))
    assert out.shape == (2, ACTION_OUTPUT_DIM)

    ref_bf16 = _reference_forward(x, params, use_bf16=True)   # same bf16-operand numerics
    ref_f32 = _reference_forward(x, params, use_bf16=False)   # full-precision sanity check
    assert jnp.allclose(out, ref_bf16, atol=5e-3, rtol=5e-3), "mismatch vs bf16 reference"
    assert jnp.allclose(out, ref_f32, atol=5e-2, rtol=5e-2), "drifted too far from f32 reference"

    print("KERNEL_OK")
</pallas_src>

<mosaic_0001>
module attributes {stable_mosaic.version = 11 : i64} {
  func.func @_qlearner_kernel(%arg0: i32, %arg1: memref<128x32xbf16, #tpu.memory_space<vmem>>, %arg2: memref<32x64xbf16, #tpu.memory_space<vmem>>, %arg3: memref<1x64xf32, #tpu.memory_space<vmem>>, %arg4: memref<64x128xbf16, #tpu.memory_space<vmem>>, %arg5: memref<1x128xf32, #tpu.memory_space<vmem>>, %arg6: memref<128x4xbf16, #tpu.memory_space<vmem>>, %arg7: memref<1x4xf32, #tpu.memory_space<vmem>>, %arg8: memref<128x4xf32, #tpu.memory_space<vmem>>) attributes {dimension_semantics = [#tpu.dimension_semantics<parallel>], iteration_bounds = array<i64: 1>, scalar_prefetch = 0 : i64, scratch_operands = 0 : i64, tpu.core_type = #tpu.core_type<tc>, window_params = [{transform_indices = @transform_0, window_bounds = array<i64: 128, 32>}, {pipeline_mode = #tpu.pipeline_mode<synchronous>, transform_indices = @transform_1, window_bounds = array<i64: 32, 64>}, {pipeline_mode = #tpu.pipeline_mode<synchronous>, transform_indices = @transform_2, window_bounds = array<i64: 1, 64>}, {pipeline_mode = #tpu.pipeline_mode<synchronous>, transform_indices = @transform_3, window_bounds = array<i64: 64, 128>}, {pipeline_mode = #tpu.pipeline_mode<synchronous>, transform_indices = @transform_4, window_bounds = array<i64: 1, 128>}, {pipeline_mode = #tpu.pipeline_mode<synchronous>, transform_indices = @transform_5, window_bounds = array<i64: 128, 4>}, {pipeline_mode = #tpu.pipeline_mode<synchronous>, transform_indices = @transform_6, window_bounds = array<i64: 1, 4>}, {transform_indices = @transform_7, window_bounds = array<i64: 128, 4>}]} {
    %c0 = arith.constant 0 : index
    %c0_0 = arith.constant 0 : index
    %0 = vector.load %arg1[%c0, %c0_0] : memref<128x32xbf16, #tpu.memory_space<vmem>>, vector<128x32xbf16>
    %c0_1 = arith.constant 0 : index
    %c0_2 = arith.constant 0 : index
    %1 = vector.load %arg2[%c0_1, %c0_2] : memref<32x64xbf16, #tpu.memory_space<vmem>>, vector<32x64xbf16>
    %cst = arith.constant dense<0.000000e+00> : vector<128x64xf32>
    %2 = tpu.matmul %0, %1, %cst {dimension_numbers = #tpu.dot_dimension_numbers<[1], [0], [0], [1], [0, 0, 1, 1], [], []>} : vector<128x32xbf16>, vector<32x64xbf16>, vector<128x64xf32> -> vector<128x64xf32>
    %c0_3 = arith.constant 0 : index
    %c0_4 = arith.constant 0 : index
    %3 = vector.load %arg3[%c0_3, %c0_4] : memref<1x64xf32, #tpu.memory_space<vmem>>, vector<1x64xf32>
    %4 = vector.broadcast %3 : vector<1x64xf32> to vector<128x64xf32>
    %5 = arith.addf %2, %4 : vector<128x64xf32>
    %cst_5 = arith.constant 0.000000e+00 : f32
    %6 = vector.broadcast %cst_5 : f32 to vector<128x64xf32>
    %7 = arith.maximumf %5, %6 : vector<128x64xf32>
    %8 = arith.truncf %7 : vector<128x64xf32> to vector<128x64xbf16>
    %c0_6 = arith.constant 0 : index
    %c0_7 = arith.constant 0 : index
    %9 = vector.load %arg4[%c0_6, %c0_7] : memref<64x128xbf16, #tpu.memory_space<vmem>>, vector<64x128xbf16>
    %cst_8 = arith.constant dense<0.000000e+00> : vector<128x128xf32>
    %10 = tpu.matmul %8, %9, %cst_8 {dimension_numbers = #tpu.dot_dimension_numbers<[1], [0], [0], [1], [0, 0, 1, 1], [], []>} : vector<128x64xbf16>, vector<64x128xbf16>, vector<128x128xf32> -> vector<128x128xf32>
    %c0_9 = arith.constant 0 : index
    %c0_10 = arith.constant 0 : index
    %11 = vector.load %arg5[%c0_9, %c0_10] : memref<1x128xf32, #tpu.memory_space<vmem>>, vector<1x128xf32>
    %12 = vector.broadcast %11 : vector<1x128xf32> to vector<128x128xf32>
    %13 = arith.addf %10, %12 : vector<128x128xf32>
    %cst_11 = arith.constant 0.000000e+00 : f32
    %14 = vector.broadcast %cst_11 : f32 to vector<128x128xf32>
    %15 = arith.maximumf %13, %14 : vector<128x128xf32>
    %16 = arith.truncf %15 : vector<128x128xf32> to vector<128x128xbf16>
    %c0_12 = arith.constant 0 : index
    %c0_13 = arith.constant 0 : index
    %17 = vector.load %arg6[%c0_12, %c0_13] : memref<128x4xbf16, #tpu.memory_space<vmem>>, vector<128x4xbf16>
    %cst_14 = arith.constant dense<0.000000e+00> : vector<128x4xf32>
    %18 = tpu.matmul %16, %17, %cst_14 {dimension_numbers = #tpu.dot_dimension_numbers<[1], [0], [0], [1], [0, 0, 1, 1], [], []>} : vector<128x128xbf16>, vector<128x4xbf16>, vector<128x4xf32> -> vector<128x4xf32>
    %c0_15 = arith.constant 0 : index
    %c0_16 = arith.constant 0 : index
    %19 = vector.load %arg7[%c0_15, %c0_16] : memref<1x4xf32, #tpu.memory_space<vmem>>, vector<1x4xf32>
    %20 = vector.broadcast %19 : vector<1x4xf32> to vector<128x4xf32>
    %21 = arith.addf %18, %20 : vector<128x4xf32>
    %c0_17 = arith.constant 0 : index
    %c0_18 = arith.constant 0 : index
    %22 = vector.load %arg8[%c0_17, %c0_18] : memref<128x4xf32, #tpu.memory_space<vmem>>, vector<128x4xf32>
    tpu.vector_store %arg8[%c0_17, %c0_18], %21 {strides = array<i32>} : memref<128x4xf32, #tpu.memory_space<vmem>>, vector<128x4xf32>,
    return
  }
  func.func @transform_0(%arg0: i32) -> (i32, i32) {
    %c0_i32 = arith.constant 0 : i32
    %c0_i32_0 = arith.constant 0 : i32
    return %arg0, %c0_i32 : i32, i32
  }
  func.func @transform_1(%arg0: i32) -> (i32, i32) {
    %c0_i32 = arith.constant 0 : i32
    %c0_i32_0 = arith.constant 0 : i32
    %c0_i32_1 = arith.constant 0 : i32
    return %c0_i32, %c0_i32_0 : i32, i32
  }
  func.func @transform_2(%arg0: i32) -> (i32, i32) {
    %c0_i32 = arith.constant 0 : i32
    %c0_i32_0 = arith.constant 0 : i32
    %c0_i32_1 = arith.constant 0 : i32
    return %c0_i32, %c0_i32_0 : i32, i32
  }
  func.func @transform_3(%arg0: i32) -> (i32, i32) {
    %c0_i32 = arith.constant 0 : i32
    %c0_i32_0 = arith.constant 0 : i32
    %c0_i32_1 = arith.constant 0 : i32
    return %c0_i32, %c0_i32_0 : i32, i32
  }
  func.func @transform_4(%arg0: i32) -> (i32, i32) {
    %c0_i32 = arith.constant 0 : i32
    %c0_i32_0 = arith.constant 0 : i32
    %c0_i32_1 = arith.constant 0 : i32
    return %c0_i32, %c0_i32_0 : i32, i32
  }
  func.func @transform_5(%arg0: i32) -> (i32, i32) {
    %c0_i32 = arith.constant 0 : i32
    %c0_i32_0 = arith.constant 0 : i32
    %c0_i32_1 = arith.constant 0 : i32
    return %c0_i32, %c0_i32_0 : i32, i32
  }
  func.func @transform_6(%arg0: i32) -> (i32, i32) {
    %c0_i32 = arith.constant 0 : i32
    %c0_i32_0 = arith.constant 0 : i32
    %c0_i32_1 = arith.constant 0 : i32
    return %c0_i32, %c0_i32_0 : i32, i32
  }
  func.func @transform_7(%arg0: i32) -> (i32, i32) {
    %c0_i32 = arith.constant 0 : i32
    %c0_i32_0 = arith.constant 0 : i32
    return %arg0, %c0_i32 : i32, i32
  }
}

</mosaic_0001>

<bundles_post_ra>
// kernel: q_learner_forward.1
= control target key start
LH: loop header
LB: loop body
LE: loop exit
PB: predicated region body
PF: predicated region fallthrough
CT: control target
= control target key end

     0   :  { %vm106_vm0 = vcmask 261120   ;;  %vm291_vm1 = vcmask 523264   ;;  %vm605_vm2 = vcmask 31744   ;;  %s1044_s1 = inlined_call_operand.vmem [shape: bf16[32,64], index: 1, kind: input, shape index: {}]   ;;  %s1045_s0 = inlined_call_operand.vmem [shape: bf16[128,32], index: 0, kind: input, shape index: {}]   ;;  %s1046_s3 = inlined_call_operand.vmem [shape: bf16[64,128], index: 3, kind: input, shape index: {}]   ;;  %s1047_s5 = inlined_call_operand.vmem [shape: bf16[128,4], index: 5, kind: input, shape index: {}]   ;;  %s1048_s2 = inlined_call_operand.vmem [shape: f32[1,64], index: 2, kind: input, shape index: {}]   ;;  %s1049_s4 = inlined_call_operand.vmem [shape: f32[1,128], index: 4, kind: input, shape index: {}]   ;;  %s1050_s6 = inlined_call_operand.vmem [shape: f32[1,4], index: 6, kind: input, shape index: {}]   ;;  %s1051_s7 = inlined_call_operand.vmem [shape: f32[128,4], index: 7, kind: output, shape index: {}]  }
   0x1   :  { %v797_v0 = vld [vmem:[%s1044_s1 + $0x8] sm:$0xff]   ;;  %v798_v1 = vld [vmem:[%s1044_s1] sm:$0xff]   ;;  %v801_v4 = vld [vmem:[%s1045_s0 + $0x10] sm:$0xff]  }
   0x2   :  { %705 = vmatprep.subr.bf16.mxu0 %v797_v0  ;;  %v799_v2 = vld [vmem:[%s1045_s0] sm:$0xff]   ;;  %v800_v3 = vld [vmem:[%s1045_s0 + $0x8] sm:$0xff]   ;;  %v807_v5 = vld [vmem:[%s1046_s3 + $0x18] sm:$0xff]  }
   0x3   :  { %706 = vmatpush3.bf16.msra.mxu0 %v797_v0  ;;  %709 = vmatprep.mubr.msk.bf16.mxu0 %vm106_vm0, %v799_v2  ;;  %v802_v6 = vld [vmem:[%s1045_s0 + $0x18] sm:$0xff]   ;;  %v803_v7 = vld [vmem:[%s1045_s0 + $0x20] sm:$0xff]   ;;  %v804_v8 = vld [vmem:[%s1045_s0 + $0x28] sm:$0xff]  }
   0x4   :  { %707 = vmatprep.subr.bf16.mxu0 %v798_v1  ;;  %725 = vmatprep.subr.bf16.mxu1 %v807_v5  ;;  %v805_v9 = vld [vmem:[%s1045_s0 + $0x30] sm:$0xff]   ;;  %v806_v10 = vld [vmem:[%s1045_s0 + $0x38] sm:$0xff]   ;;  %v809_v12 = vld [vmem:[%s1046_s3 + $0x8] sm:$0xff]  }
   0x5   :  { %726 = vmatpush3.bf16.msra.mxu1 %v807_v5  ;;  %v808_v11 = vld [vmem:[%s1046_s3 + $0x10] sm:$0xff]   ;;  %v810_v13 = vld [vmem:[%s1046_s3] sm:$0xff]   ;;  %v811_v14 = vld [vmem:[%s1047_s5 + $0x38] sm:$0xff]  }
   0x6   :  { %727 = vmatprep.subr.bf16.mxu1 %v808_v11  ;;  %v812_v15 = vld [vmem:[%s1047_s5 + $0x30] sm:$0xff]   ;;  %v813_v16 = vld [vmem:[%s1047_s5 + $0x28] sm:$0xff]   ;;  %v921_v17 = vld [vmem:[%s1047_s5 + $0x20] sm:$0xff]  }
   0x7   :  { %708 = vmatpush3.bf16.msra.mxu0 %v798_v1  ;;  %v927_v18 = vld [vmem:[%s1047_s5 + $0x18] sm:$0xff]   ;;  %v935_v21 = vld [vmem:[%s1048_s2] ss:$0 sm:$0xff] }
   0x8   :  { %749 = vmatprep.subr.bf16.mxu0 %v811_v14 }
   0x9   :  { %728 = vmatpush3.bf16.msra.mxu1 %v808_v11 }
   0xa   :  { %710 = vmatmul.mubr.msk.bf16.vlgmr.msra.gmra.mxu0 %vm106_vm0, %v800_v3  ;;  %729 = vmatprep.subr.bf16.mxu1 %v809_v12 }
   0xb   :  { %713 = vmatprep.mubr.msk.bf16.mxu0 %vm106_vm0, %v801_v4  ;;  %750 = vmatpush3.bf16.msra.mxu0 %v811_v14 }
   0xc   :  { %751 = vmatprep.subr.bf16.mxu0 %v812_v15 }
   0xd   :  { %730 = vmatpush3.bf16.msra.mxu1 %v809_v12  ;;  %v816_v12 = vld [vmem:[%s1047_s5 + $0x10] sm:$0xff]  }
   0xe   :  { %731 = vmatprep.subr.bf16.mxu1 %v810_v13 }
   0xf   :  { %752 = vmatpush3.bf16.msra.mxu0 %v812_v15 }
  0x10   :  { %753 = vmatprep.subr.bf16.mxu0 %v813_v16 }
  0x11   :  { %732 = vmatpush3.bf16.msra.mxu1 %v810_v13  ;;  %v817_v13 = vld [vmem:[%s1047_s5 + $0x8] sm:$0xff]  }
  0x12   :  { %714 = vmatmul.mubr.msk.bf16.gmra.mxu0 %vm106_vm0, %v802_v6  ;;  %781 = vmatprep.subr.bf16.mxu1 %v811_v14 }
  0x13   :  { %717 = vmatprep.mubr.msk.bf16.mxu0 %vm106_vm0, %v803_v7  ;;  %754 = vmatpush3.bf16.msra.mxu0 %v813_v16 }
  0x14   :  { %755 = vmatprep.subr.bf16.mxu0 %v921_v17 }
  0x17   :  { %756 = vmatpush3.bf16.msra.mxu0 %v921_v17 }
  0x18   :  { %757 = vmatprep.subr.bf16.mxu0 %v927_v18 }
  0x1a   :  { %718 = vmatmul.mubr.msk.bf16.gmra.mxu0 %vm106_vm0, %v804_v8 }
  0x1b   :  { %721 = vmatprep.mubr.msk.bf16.mxu0 %vm106_vm0, %v805_v9  ;;  %758 = vmatpush3.bf16.msra.mxu0 %v927_v18 }
  0x1c   :  { %759 = vmatprep.subr.bf16.mxu0 %v816_v12 }
  0x1f   :  { %760 = vmatpush3.bf16.msra.mxu0 %v816_v12 }
  0x20   :  { %761 = vmatprep.subr.bf16.mxu0 %v817_v13 }
  0x22   :  { %722 = vmatmul.mubr.msk.bf16.gmra.mxu0 %vm106_vm0, %v806_v10 }
  0x23   :  { %762 = vmatpush3.bf16.msra.mxu0 %v817_v13 }
  0xca   :  { %v711_v19 = vpop.f32.mrf.mxu0 }
  0xcb   :  { %v174_v25 = vadd.f32 %v711_v19, %v935_v21 }
  0xcc   :  { %v165_v20 = vpop.f32.mrf.mxu0 }
  0xcd   :  { %v166_v23 = vadd.f32 %v935_v21, %v165_v20  ;;  %v230_v32 = vmax.f32 %v174_v25, 0.0 }
  0xce   :  { %v712_v22 = vpop.f32.mrf.mxu0 }
  0xcf   :  { %v177_v24 = vadd.f32 %v712_v22, %v935_v21  ;;  %v228_v30 = vmax.f32 %v166_v23, 0.0 }
  0xd0   :  { %v168_v26 = vpop.f32.mrf.mxu0 }
  0xd1   :  { %v169_v27 = vadd.f32 %v935_v21, %v168_v26  ;;  %v231_v28 = vmax.f32 %v177_v24, 0.0 }
  0xd2   :  { %v715_v29 = vpop.f32.mrf.mxu0 }
  0xd3   :  { %v229_v31 = vmax.f32 %v169_v27, 0.0  ;;  %v245_v35 = vpack.c.bf16 %v231_v28, %v230_v32  ;;  %v190_v39 = vadd.f32 %v715_v29, %v935_v21 }
  0xd4   :  { %v181_v33 = vpop.f32.mrf.mxu0 }
  0xd5   :  { %v244_v34 = vpack.c.bf16 %v229_v31, %v228_v30  ;;  %v182_v37 = vadd.f32 %v935_v21, %v181_v33  ;;  %v234_v46 = vmax.f32 %v190_v39, 0.0 }
  0xd6   :  { %v716_v36 = vpop.f32.mrf.mxu0 }
  0xd7   :  { %v193_v38 = vadd.f32 %v716_v36, %v935_v21  ;;  %733 = vmatprep.mubr.msk.bf16.mxu1 %vm291_vm1, %v244_v34  ;;  %v232_v44 = vmax.f32 %v182_v37, 0.0 }
  0xd8   :  { %v184_v40 = vpop.f32.mrf.mxu0  ;;  %734 = vmatmul.mubr.msk.bf16.vlgmr.msra.gmra.mxu1 %vm291_vm1, %v245_v35 }
  0xd9   :  { %v185_v41 = vadd.f32 %v935_v21, %v184_v40  ;;  %789 = vmatpush3.bf16.msra.mxu1 %v811_v14  ;;  %v235_v42 = vmax.f32 %v193_v38, 0.0  ;;  %v818_v14 = vld [vmem:[%s1047_s5] sm:$0xff]  }
  0xda   :  { %v719_v43 = vpop.f32.mrf.mxu0  ;;  %782 = vmatprep.subr.bf16.mxu1 %v812_v15  ;;  %763 = vmatprep.subr.bf16.mxu0 %v818_v14 }
  0xdb   :  { %v233_v45 = vmax.f32 %v185_v41, 0.0  ;;  %v247_v49 = vpack.c.bf16 %v235_v42, %v234_v46  ;;  %v206_v53 = vadd.f32 %v719_v43, %v935_v21  ;;  %764 = vmatpush3.bf16.msra.mxu0 %v818_v14 }
  0xdc   :  { %v197_v47 = vpop.f32.mrf.mxu0 }
  0xdd   :  { %v246_v48 = vpack.c.bf16 %v233_v45, %v232_v44  ;;  %790 = vmatpush3.bf16.msra.mxu1 %v812_v15  ;;  %v198_v51 = vadd.f32 %v935_v21, %v197_v47  ;;  %v238_v60 = vmax.f32 %v206_v53, 0.0 }
  0xde   :  { %v720_v50 = vpop.f32.mrf.mxu0  ;;  %783 = vmatprep.subr.bf16.mxu1 %v813_v16 }
  0xdf   :  { %v209_v52 = vadd.f32 %v720_v50, %v935_v21  ;;  %737 = vmatprep.mubr.msk.bf16.mxu1 %vm291_vm1, %v246_v48  ;;  %v236_v58 = vmax.f32 %v198_v51, 0.0 }
  0xe0   :  { %v200_v54 = vpop.f32.mrf.mxu0  ;;  %738 = vmatmul.mubr.msk.bf16.gmra.mxu1 %vm291_vm1, %v247_v49 }
  0xe1   :  { %v201_v55 = vadd.f32 %v935_v21, %v200_v54  ;;  %791 = vmatpush3.bf16.msra.mxu1 %v813_v16  ;;  %v239_v56 = vmax.f32 %v209_v52, 0.0 }
  0xe2   :  { %v723_v57 = vpop.f32.mrf.mxu0  ;;  %784 = vmatprep.subr.bf16.mxu1 %v921_v17 }
  0xe3   :  { %v237_v59 = vmax.f32 %v201_v55, 0.0  ;;  %v249_v63 = vpack.c.bf16 %v239_v56, %v238_v60  ;;  %v222_v3 = vadd.f32 %v723_v57, %v935_v21 }
  0xe4   :  { %v213_v61 = vpop.f32.mrf.mxu0 }
  0xe5   :  { %v248_v62 = vpack.c.bf16 %v237_v59, %v236_v58  ;;  %792 = vmatpush3.bf16.msra.mxu1 %v921_v17  ;;  %v214_v1 = vadd.f32 %v935_v21, %v213_v61  ;;  %v242_v9 = vmax.f32 %v222_v3, 0.0  ;;  %v645_v17 = vld [vmem:[%s1049_s4] ss:$0 sm:$0xff] }
  0xe6   :  { %v724_v0 = vpop.f32.mrf.mxu0  ;;  %785 = vmatprep.subr.bf16.mxu1 %v927_v18 }
  0xe7   :  { %v225_v2 = vadd.f32 %v724_v0, %v935_v21  ;;  %741 = vmatprep.mubr.msk.bf16.mxu1 %vm291_vm1, %v248_v62  ;;  %v240_v7 = vmax.f32 %v214_v1, 0.0 }
  0xe8   :  { %v216_v4 = vpop.f32.mrf.mxu0  ;;  %742 = vmatmul.mubr.msk.bf16.gmra.mxu1 %vm291_vm1, %v249_v63 }
  0xe9   :  { %v217_v5 = vadd.f32 %v935_v21, %v216_v4  ;;  %793 = vmatpush3.bf16.msra.mxu1 %v927_v18  ;;  %v243_v6 = vmax.f32 %v225_v2, 0.0 }
  0xea   :  { %786 = vmatprep.subr.bf16.mxu1 %v816_v12 }
  0xeb   :  { %v241_v8 = vmax.f32 %v217_v5, 0.0  ;;  %v251_v11 = vpack.c.bf16 %v243_v6, %v242_v9 }
  0xed   :  { %v250_v10 = vpack.c.bf16 %v241_v8, %v240_v7  ;;  %794 = vmatpush3.bf16.msra.mxu1 %v816_v12  ;;  %v658_v8 = vld [vmem:[%s1050_s6] ss:$0 sm:$0xff] }
  0xee   :  { %787 = vmatprep.subr.bf16.mxu1 %v817_v13 }
  0xef   :  { %745 = vmatprep.mubr.msk.bf16.mxu1 %vm291_vm1, %v250_v10 }
  0xf0   :  { %746 = vmatmul.mubr.msk.bf16.gmra.mxu1 %vm291_vm1, %v251_v11 }
  0xf1   :  { %795 = vmatpush3.bf16.msra.mxu1 %v817_v13 }
  0xf2   :  { %788 = vmatprep.subr.bf16.mxu1 %v818_v14 }
  0xf5   :  { %796 = vmatpush3.bf16.msra.mxu1 %v818_v14 }
 0x198   :  { %v735_v15 = vpop.f32.mrf.mxu1 }
 0x199   :  { %v359_v21 = vadd.f32 %v735_v15, %v645_v17 }
 0x19a   :  { %v350_v16 = vpop.f32.mrf.mxu1 }
 0x19b   :  { %v351_v19 = vadd.f32 %v645_v17, %v350_v16  ;;  %v415_v28 = vmax.f32 %v359_v21, 0.0 }
 0x19c   :  { %v736_v18 = vpop.f32.mrf.mxu1 }
 0x19d   :  { %v362_v20 = vadd.f32 %v736_v18, %v645_v17  ;;  %v413_v26 = vmax.f32 %v351_v19, 0.0 }
 0x19e   :  { %v353_v22 = vpop.f32.mrf.mxu1 }
 0x19f   :  { %v354_v23 = vadd.f32 %v645_v17, %v353_v22  ;;  %v416_v24 = vmax.f32 %v362_v20, 0.0 }
 0x1a0   :  { %v739_v25 = vpop.f32.mrf.mxu1 }
 0x1a1   :  { %v414_v27 = vmax.f32 %v354_v23, 0.0  ;;  %v430_v31 = vpack.c.bf16 %v416_v24, %v415_v28  ;;  %v375_v35 = vadd.f32 %v739_v25, %v645_v17 }
 0x1a2   :  { %v366_v29 = vpop.f32.mrf.mxu1 }
 0x1a3   :  { %v429_v30 = vpack.c.bf16 %v414_v27, %v413_v26  ;;  %v367_v33 = vadd.f32 %v645_v17, %v366_v29  ;;  %v419_v42 = vmax.f32 %v375_v35, 0.0 }
 0x1a4   :  { %v740_v32 = vpop.f32.mrf.mxu1 }
 0x1a5   :  { %v378_v34 = vadd.f32 %v740_v32, %v645_v17  ;;  %765 = vmatprep.mubr.bf16.mxu0 %v429_v30  ;;  %v417_v40 = vmax.f32 %v367_v33, 0.0 }
 0x1a6   :  { %v369_v36 = vpop.f32.mrf.mxu1  ;;  %766 = vmatmul.mubr.bf16.vlgmr.msra.gmra.mxu0 %v430_v31 }
 0x1a7   :  { %v370_v37 = vadd.f32 %v645_v17, %v369_v36  ;;  %v420_v38 = vmax.f32 %v378_v34, 0.0 }
 0x1a8   :  { %v743_v39 = vpop.f32.mrf.mxu1 }
 0x1a9   :  { %v418_v41 = vmax.f32 %v370_v37, 0.0  ;;  %v432_v45 = vpack.c.bf16 %v420_v38, %v419_v42  ;;  %v391_v49 = vadd.f32 %v743_v39, %v645_v17 }
 0x1aa   :  { %v382_v43 = vpop.f32.mrf.mxu1 }
 0x1ab   :  { %v431_v44 = vpack.c.bf16 %v418_v41, %v417_v40  ;;  %v383_v47 = vadd.f32 %v645_v17, %v382_v43  ;;  %v423_v56 = vmax.f32 %v391_v49, 0.0 }
 0x1ac   :  { %v744_v46 = vpop.f32.mrf.mxu1 }
 0x1ad   :  { %v394_v48 = vadd.f32 %v744_v46, %v645_v17  ;;  %769 = vmatprep.mubr.bf16.mxu0 %v431_v44  ;;  %v421_v54 = vmax.f32 %v383_v47, 0.0 }
 0x1ae   :  { %v385_v50 = vpop.f32.mrf.mxu1  ;;  %770 = vmatmul.mubr.bf16.gmra.mxu0 %v432_v45 }
 0x1af   :  { %v386_v51 = vadd.f32 %v645_v17, %v385_v50  ;;  %v424_v52 = vmax.f32 %v394_v48, 0.0 }
 0x1b0   :  { %v747_v53 = vpop.f32.mrf.mxu1 }
 0x1b1   :  { %v422_v55 = vmax.f32 %v386_v51, 0.0  ;;  %v434_v59 = vpack.c.bf16 %v424_v52, %v423_v56  ;;  %v407_v63 = vadd.f32 %v747_v53, %v645_v17 }
 0x1b2   :  { %v398_v57 = vpop.f32.mrf.mxu1 }
 0x1b3   :  { %v433_v58 = vpack.c.bf16 %v422_v55, %v421_v54  ;;  %v399_v61 = vadd.f32 %v645_v17, %v398_v57  ;;  %v427_v5 = vmax.f32 %v407_v63, 0.0 }
 0x1b4   :  { %v748_v60 = vpop.f32.mrf.mxu1 }
 0x1b5   :  { %v410_v62 = vadd.f32 %v748_v60, %v645_v17  ;;  %773 = vmatprep.mubr.bf16.mxu0 %v433_v58  ;;  %v425_v3 = vmax.f32 %v399_v61, 0.0 }
 0x1b6   :  { %v401_v0 = vpop.f32.mrf.mxu1  ;;  %774 = vmatmul.mubr.bf16.gmra.mxu0 %v434_v59 }
 0x1b7   :  { %v402_v1 = vadd.f32 %v645_v17, %v401_v0  ;;  %v428_v2 = vmax.f32 %v410_v62, 0.0 }
 0x1b9   :  { %v426_v4 = vmax.f32 %v402_v1, 0.0  ;;  %v436_v7 = vpack.c.bf16 %v428_v2, %v427_v5 }
 0x1bb   :  { %v435_v6 = vpack.c.bf16 %v426_v4, %v425_v3 }
 0x1bd   :  { %777 = vmatprep.mubr.bf16.mxu1 %v435_v6 }
 0x1be   :  { %778 = vmatmul.mubr.bf16.vlgmr.msra.gmra.mxu1 %v436_v7 }
 0x266   :  { %v767_v9 = vpop.f32.mrf.mxu0 }
 0x267   :  { %v551_v10 = vadd.f32 %v767_v9, %v658_v8 }
 0x268   :  { %v542_v11 = vpop.f32.mrf.mxu0 }
 0x269   :  { %608 = vst.msk [vmem:[%s1051_s7 + $0x10] sm:$0xff] %vm605_vm2, %v551_v10  ;;  %v543_v12 = vadd.f32 %v658_v8, %v542_v11 }
 0x26a   :  { %v768_v13 = vpop.f32.mrf.mxu0 }
 0x26b   :  { %606 = vst.msk [vmem:[%s1051_s7] sm:$0xff] %vm605_vm2, %v543_v12  ;;  %v554_v14 = vadd.f32 %v768_v13, %v658_v8 }
 0x26c   :  { %v545_v15 = vpop.f32.mrf.mxu0 }
 0x26d   :  { %609 = vst.msk [vmem:[%s1051_s7 + $0x18] sm:$0xff] %vm605_vm2, %v554_v14  ;;  %v546_v16 = vadd.f32 %v658_v8, %v545_v15 }
 0x26e   :  { %v771_v17 = vpop.f32.mrf.mxu0 }
 0x26f   :  { %607 = vst.msk [vmem:[%s1051_s7 + $0x8] sm:$0xff] %vm605_vm2, %v546_v16  ;;  %v567_v18 = vadd.f32 %v771_v17, %v658_v8 }
 0x270   :  { %v558_v19 = vpop.f32.mrf.mxu0 }
 0x271   :  { %612 = vst.msk [vmem:[%s1051_s7 + $0x30] sm:$0xff] %vm605_vm2, %v567_v18  ;;  %v559_v20 = vadd.f32 %v658_v8, %v558_v19 }
 0x272   :  { %v772_v21 = vpop.f32.mrf.mxu0 }
 0x273   :  { %610 = vst.msk [vmem:[%s1051_s7 + $0x20] sm:$0xff] %vm605_vm2, %v559_v20  ;;  %v570_v22 = vadd.f32 %v772_v21, %v658_v8 }
 0x274   :  { %v561_v23 = vpop.f32.mrf.mxu0 }
 0x275   :  { %613 = vst.msk [vmem:[%s1051_s7 + $0x38] sm:$0xff] %vm605_vm2, %v570_v22  ;;  %v562_v24 = vadd.f32 %v658_v8, %v561_v23 }
 0x276   :  { %v775_v25 = vpop.f32.mrf.mxu0 }
 0x277   :  { %611 = vst.msk [vmem:[%s1051_s7 + $0x28] sm:$0xff] %vm605_vm2, %v562_v24  ;;  %v583_v26 = vadd.f32 %v775_v25, %v658_v8 }
 0x278   :  { %v574_v27 = vpop.f32.mrf.mxu0 }
 0x279   :  { %616 = vst.msk [vmem:[%s1051_s7 + $0x50] sm:$0xff] %vm605_vm2, %v583_v26  ;;  %v575_v28 = vadd.f32 %v658_v8, %v574_v27 }
 0x27a   :  { %v776_v29 = vpop.f32.mrf.mxu0 }
 0x27b   :  { %614 = vst.msk [vmem:[%s1051_s7 + $0x40] sm:$0xff] %vm605_vm2, %v575_v28  ;;  %v586_v30 = vadd.f32 %v776_v29, %v658_v8 }
 0x27c   :  { %v577_v31 = vpop.f32.mrf.mxu0 }
 0x27d   :  { %617 = vst.msk [vmem:[%s1051_s7 + $0x58] sm:$0xff] %vm605_vm2, %v586_v30  ;;  %v578_v32 = vadd.f32 %v658_v8, %v577_v31 }
 0x27e   :  { %v779_v33 = vpop.f32.mrf.mxu1 }
 0x27f   :  { %615 = vst.msk [vmem:[%s1051_s7 + $0x48] sm:$0xff] %vm605_vm2, %v578_v32  ;;  %v599_v34 = vadd.f32 %v779_v33, %v658_v8 }
 0x280   :  { %v590_v35 = vpop.f32.mrf.mxu1 }
 0x281   :  { %620 = vst.msk [vmem:[%s1051_s7 + $0x70] sm:$0xff] %vm605_vm2, %v599_v34  ;;  %v591_v36 = vadd.f32 %v658_v8, %v590_v35 }
 0x282   :  { %v780_v37 = vpop.f32.mrf.mxu1 }
 0x283   :  { %618 = vst.msk [vmem:[%s1051_s7 + $0x60] sm:$0xff] %vm605_vm2, %v591_v36  ;;  %v602_v38 = vadd.f32 %v780_v37, %v658_v8 }
 0x284   :  { %v593_v39 = vpop.f32.mrf.mxu1 }
 0x285   :  { %621 = vst.msk [vmem:[%s1051_s7 + $0x78] sm:$0xff] %vm605_vm2, %v602_v38  ;;  %v594_v40 = vadd.f32 %v658_v8, %v593_v39 }
 0x287   :  { %619 = vst.msk [vmem:[%s1051_s7 + $0x68] sm:$0xff] %vm605_vm2, %v594_v40 }

</bundles_post_ra>
